<compile_context>
chip_gen: v7x
topology: tpu7x:2x2x1
jax: 0.10.0
libtpu: 0.0.40
codegen_flags: <defaults>
</compile_context>

<pallas_src>
import math

import jax
import jax.numpy as jnp
from jax.experimental import pallas as pl
from jax.experimental.pallas import tpu as pltpu

_LANE = 128                      # vreg lane width
_SUB = 8                         # vreg sublane count
_MAX_TILE_ROWS = 2048            # 3 * 2048 * 128 * 4B = 3 MiB per block
_MIN_TOTAL_BLOCKS = 8            # >= 2 blocks per TensorCore on v7x (2 TCs)
_VMEM_LIMIT_BYTES = 32 * 1024 * 1024


def _hsv_to_rgb_kernel(x_ref, o_ref):
    # Block is (1, 3, TR, 128): channel 0 = h, 1 = s, 2 = v.
    h6 = x_ref[0, 0, :, :] * (3.0 / math.pi)   # 6 * h / (2*pi), in [0, 6]
    s = x_ref[0, 1, :, :]
    v = x_ref[0, 2, :, :]
    vs = v * s

    def chan(n):
        # k = (h6 + n) mod 6.  h6 is in [0, 6] (documented input range
        # h in [0, 2*pi]), so the mod reduces to one compare + one select,
        # which is cheaper on the VALU than jnp.mod's recip/floor/mul/sub.
        k = jnp.where(h6 >= 6.0 - n, h6 + (n - 6.0), h6 + n)
        w = jnp.clip(jnp.minimum(k, 4.0 - k), 0.0, 1.0)
        return v - vs * w

    o_ref[0, 0, :, :] = chan(5.0)   # R
    o_ref[0, 1, :, :] = chan(3.0)   # G
    o_ref[0, 2, :, :] = chan(1.0)   # B


def _round_up(x: int, m: int) -> int:
    return ((x + m - 1) // m) * m


def hsv_to_rgb(image: jax.Array) -> jax.Array:
    """image: (*, 3, H, W) float32 with h in [0, 2*pi], s/v in [0, 1]."""
    if image.ndim < 3 or image.shape[-3] != 3:
        raise ValueError(f"Expected (*, 3, H, W), got {image.shape}")
    *lead, C, H, W = image.shape
    B = 1
    for d in lead:
        B *= d
    N = H * W

    # Lane-dense repack: per channel, flatten H*W and view as (rows, 128).
    rows = pl.cdiv(N, _LANE)
    n_pad = rows * _LANE

    flat = image.reshape(B, C, N)
    if n_pad != N:
        # Only when H*W is not a multiple of 128; zero padding is safe
        # (h=s=v=0 maps to a finite value that is discarded below).
        flat = jnp.pad(flat, ((0, 0), (0, 0), (0, n_pad - N)))
    x = flat.reshape(B, C, rows, _LANE)

    # Tile choice: multiple of 8 sublanes, capped for VMEM, and small enough
    # that the grid has >= _MIN_TOTAL_BLOCKS blocks (keeps both v7x
    # TensorCores busy at batch 1).  If the candidate tile would exceed the
    # row extent, fall back to a single full-extent row block (always a legal
    # block shape).  A ragged last row-block (rows % tile_rows != 0) is
    # handled by Pallas: OOB reads discarded, OOB writes masked.
    target_row_blocks = max(1, pl.cdiv(_MIN_TOTAL_BLOCKS, B))
    tile_rows = min(_MAX_TILE_ROWS,
                    _round_up(pl.cdiv(rows, target_row_blocks), _SUB))
    if tile_rows >= rows:
        tile_rows = rows
    grid = (B, pl.cdiv(rows, tile_rows))

    cost = pl.CostEstimate(
        flops=10 * B * C * H * W,
        transcendentals=0,
        bytes_accessed=2 * B * C * n_pad * 4,
    )

    out = pl.pallas_call(
        _hsv_to_rgb_kernel,
        out_shape=jax.ShapeDtypeStruct((B, C, rows, _LANE), image.dtype),
        grid_spec=pltpu.PrefetchScalarGridSpec(
            num_scalar_prefetch=0,
            grid=grid,
            in_specs=[
                pl.BlockSpec((1, C, tile_rows, _LANE), lambda b, r: (b, 0, r, 0))
            ],
            out_specs=pl.BlockSpec(
                (1, C, tile_rows, _LANE), lambda b, r: (b, 0, r, 0)
            ),
        ),
        compiler_params=pltpu.CompilerParams(
            dimension_semantics=("parallel", "parallel"),
            vmem_limit_bytes=_VMEM_LIMIT_BYTES,
        ),
        cost_estimate=cost,
    )(x)

    out = out.reshape(B, C, n_pad)
    if n_pad != N:
        out = out[:, :, :N]
    return out.reshape(image.shape)


def _hsv_to_rgb_ref(image: jax.Array) -> jax.Array:
    # Pure-jnp reference mirroring the torch gather implementation.
    h = image[..., 0, :, :] / (2.0 * math.pi)
    s = image[..., 1, :, :]
    v = image[..., 2, :, :]
    h6 = h * 6.0
    hi = jnp.mod(jnp.floor(h6), 6.0)
    f = jnp.mod(h6, 6.0) - hi
    p = v * (1.0 - s)
    q = v * (1.0 - f * s)
    t = v * (1.0 - (1.0 - f) * s)
    hil = hi.astype(jnp.int32)
    stack = jnp.stack(
        (v, q, p, p, t, v, t, v, v, q, p, p, p, p, t, v, v, q), axis=-3
    )
    idx = jnp.stack([hil, hil + 6, hil + 12], axis=-3)
    return jnp.take_along_axis(stack, idx, axis=-3)


if __name__ == "__main__":
    key = jax.random.PRNGKey(0)
    k1, k2, k3 = jax.random.split(key, 3)
    B, H, W = 2, 16, 16
    h = jax.random.uniform(k1, (B, 1, H, W), jnp.float32, 0.0, 2.0 * math.pi)
    s = jax.random.uniform(k2, (B, 1, H, W), jnp.float32, 0.0, 1.0)
    v = jax.random.uniform(k3, (B, 1, H, W), jnp.float32, 0.0, 1.0)
    x = jnp.concatenate([h, s, v], axis=1)  # (B, 3, H, W)

    out = hsv_to_rgb(x)
    jax.block_until_ready(out)

    ref = _hsv_to_rgb_ref(x)
    assert out.shape == (B, 3, H, W)
    assert jnp.allclose(out, ref, atol=1e-5, rtol=1e-5)

    print("KERNEL_OK")
</pallas_src>

<mosaic_0001>
module attributes {stable_mosaic.version = 11 : i64} {
  func.func @_hsv_to_rgb_kernel(%arg0: i32, %arg1: i32, %arg2: memref<1x3x2x128xf32, #tpu.memory_space<vmem>>, %arg3: memref<1x3x2x128xf32, #tpu.memory_space<vmem>>) attributes {dimension_semantics = [#tpu.dimension_semantics<parallel>, #tpu.dimension_semantics<parallel>], iteration_bounds = array<i64: 2, 1>, scalar_prefetch = 0 : i64, scratch_operands = 0 : i64, tpu.core_type = #tpu.core_type<tc>, window_params = [{transform_indices = @transform_0, window_bounds = array<i64: 1, 3, 2, 128>}, {transform_indices = @transform_1, window_bounds = array<i64: 1, 3, 2, 128>}]} {
    %c0 = arith.constant 0 : index
    %c0_0 = arith.constant 0 : index
    %c0_1 = arith.constant 0 : index
    %c0_2 = arith.constant 0 : index
    %0 = vector.load %arg2[%c0, %c0_0, %c0_1, %c0_2] : memref<1x3x2x128xf32, #tpu.memory_space<vmem>>, vector<1x1x2x128xf32>
    %1 = vector.shape_cast %0 : vector<1x1x2x128xf32> to vector<2x128xf32>
    %cst = arith.constant 0.954929649 : f32
    %2 = vector.broadcast %cst : f32 to vector<2x128xf32>
    %3 = arith.mulf %1, %2 : vector<2x128xf32>
    %c0_3 = arith.constant 0 : index
    %c1 = arith.constant 1 : index
    %c0_4 = arith.constant 0 : index
    %c0_5 = arith.constant 0 : index
    %4 = vector.load %arg2[%c0_3, %c1, %c0_4, %c0_5] : memref<1x3x2x128xf32, #tpu.memory_space<vmem>>, vector<1x1x2x128xf32>
    %5 = vector.shape_cast %4 : vector<1x1x2x128xf32> to vector<2x128xf32>
    %c0_6 = arith.constant 0 : index
    %c2 = arith.constant 2 : index
    %c0_7 = arith.constant 0 : index
    %c0_8 = arith.constant 0 : index
    %6 = vector.load %arg2[%c0_6, %c2, %c0_7, %c0_8] : memref<1x3x2x128xf32, #tpu.memory_space<vmem>>, vector<1x1x2x128xf32>
    %7 = vector.shape_cast %6 : vector<1x1x2x128xf32> to vector<2x128xf32>
    %8 = arith.mulf %7, %5 : vector<2x128xf32>
    %cst_9 = arith.constant 1.000000e+00 : f32
    %9 = vector.broadcast %cst_9 : f32 to vector<2x128xf32>
    %10 = arith.cmpf oge, %3, %9 : vector<2x128xf32>
    %cst_10 = arith.constant -1.000000e+00 : f32
    %11 = vector.broadcast %cst_10 : f32 to vector<2x128xf32>
    %12 = arith.addf %3, %11 : vector<2x128xf32>
    %cst_11 = arith.constant 5.000000e+00 : f32
    %13 = vector.broadcast %cst_11 : f32 to vector<2x128xf32>
    %14 = arith.addf %3, %13 : vector<2x128xf32>
    %15 = arith.select %10, %12, %14 : vector<2x128xi1>, vector<2x128xf32>
    %cst_12 = arith.constant 4.000000e+00 : f32
    %16 = vector.broadcast %cst_12 : f32 to vector<2x128xf32>
    %17 = arith.subf %16, %15 : vector<2x128xf32>
    %18 = arith.minimumf %15, %17 : vector<2x128xf32>
    %cst_13 = arith.constant 0.000000e+00 : f32
    %cst_14 = arith.constant 1.000000e+00 : f32
    %19 = vector.broadcast %cst_13 : f32 to vector<2x128xf32>
    %20 = arith.maximumf %19, %18 : vector<2x128xf32>
    %21 = vector.broadcast %cst_14 : f32 to vector<2x128xf32>
    %22 = arith.minimumf %21, %20 : vector<2x128xf32>
    %23 = arith.mulf %8, %22 : vector<2x128xf32>
    %24 = arith.subf %7, %23 : vector<2x128xf32>
    %c0_15 = arith.constant 0 : index
    %c0_16 = arith.constant 0 : index
    %c0_17 = arith.constant 0 : index
    %c0_18 = arith.constant 0 : index
    %25 = vector.load %arg3[%c0_15, %c0_16, %c0_17, %c0_18] : memref<1x3x2x128xf32, #tpu.memory_space<vmem>>, vector<1x1x2x128xf32>
    %26 = vector.shape_cast %25 : vector<1x1x2x128xf32> to vector<2x128xf32>
    %27 = vector.shape_cast %24 : vector<2x128xf32> to vector<1x1x2x128xf32>
    tpu.vector_store %arg3[%c0_15, %c0_16, %c0_17, %c0_18], %27 {strides = array<i32>} : memref<1x3x2x128xf32, #tpu.memory_space<vmem>>, vector<1x1x2x128xf32>,
    %cst_19 = arith.constant 3.000000e+00 : f32
    %28 = vector.broadcast %cst_19 : f32 to vector<2x128xf32>
    %29 = arith.cmpf oge, %3, %28 : vector<2x128xf32>
    %cst_20 = arith.constant -3.000000e+00 : f32
    %30 = vector.broadcast %cst_20 : f32 to vector<2x128xf32>
    %31 = arith.addf %3, %30 : vector<2x128xf32>
    %cst_21 = arith.constant 3.000000e+00 : f32
    %32 = vector.broadcast %cst_21 : f32 to vector<2x128xf32>
    %33 = arith.addf %3, %32 : vector<2x128xf32>
    %34 = arith.select %29, %31, %33 : vector<2x128xi1>, vector<2x128xf32>
    %cst_22 = arith.constant 4.000000e+00 : f32
    %35 = vector.broadcast %cst_22 : f32 to vector<2x128xf32>
    %36 = arith.subf %35, %34 : vector<2x128xf32>
    %37 = arith.minimumf %34, %36 : vector<2x128xf32>
    %cst_23 = arith.constant 0.000000e+00 : f32
    %cst_24 = arith.constant 1.000000e+00 : f32
    %38 = vector.broadcast %cst_23 : f32 to vector<2x128xf32>
    %39 = arith.maximumf %38, %37 : vector<2x128xf32>
    %40 = vector.broadcast %cst_24 : f32 to vector<2x128xf32>
    %41 = arith.minimumf %40, %39 : vector<2x128xf32>
    %42 = arith.mulf %8, %41 : vector<2x128xf32>
    %43 = arith.subf %7, %42 : vector<2x128xf32>
    %c0_25 = arith.constant 0 : index
    %c1_26 = arith.constant 1 : index
    %c0_27 = arith.constant 0 : index
    %c0_28 = arith.constant 0 : index
    %44 = vector.load %arg3[%c0_25, %c1_26, %c0_27, %c0_28] : memref<1x3x2x128xf32, #tpu.memory_space<vmem>>, vector<1x1x2x128xf32>
    %45 = vector.shape_cast %44 : vector<1x1x2x128xf32> to vector<2x128xf32>
    %46 = vector.shape_cast %43 : vector<2x128xf32> to vector<1x1x2x128xf32>
    tpu.vector_store %arg3[%c0_25, %c1_26, %c0_27, %c0_28], %46 {strides = array<i32>} : memref<1x3x2x128xf32, #tpu.memory_space<vmem>>, vector<1x1x2x128xf32>,
    %cst_29 = arith.constant 5.000000e+00 : f32
    %47 = vector.broadcast %cst_29 : f32 to vector<2x128xf32>
    %48 = arith.cmpf oge, %3, %47 : vector<2x128xf32>
    %cst_30 = arith.constant -5.000000e+00 : f32
    %49 = vector.broadcast %cst_30 : f32 to vector<2x128xf32>
    %50 = arith.addf %3, %49 : vector<2x128xf32>
    %cst_31 = arith.constant 1.000000e+00 : f32
    %51 = vector.broadcast %cst_31 : f32 to vector<2x128xf32>
    %52 = arith.addf %3, %51 : vector<2x128xf32>
    %53 = arith.select %48, %50, %52 : vector<2x128xi1>, vector<2x128xf32>
    %cst_32 = arith.constant 4.000000e+00 : f32
    %54 = vector.broadcast %cst_32 : f32 to vector<2x128xf32>
    %55 = arith.subf %54, %53 : vector<2x128xf32>
    %56 = arith.minimumf %53, %55 : vector<2x128xf32>
    %cst_33 = arith.constant 0.000000e+00 : f32
    %cst_34 = arith.constant 1.000000e+00 : f32
    %57 = vector.broadcast %cst_33 : f32 to vector<2x128xf32>
    %58 = arith.maximumf %57, %56 : vector<2x128xf32>
    %59 = vector.broadcast %cst_34 : f32 to vector<2x128xf32>
    %60 = arith.minimumf %59, %58 : vector<2x128xf32>
    %61 = arith.mulf %8, %60 : vector<2x128xf32>
    %62 = arith.subf %7, %61 : vector<2x128xf32>
    %c0_35 = arith.constant 0 : index
    %c2_36 = arith.constant 2 : index
    %c0_37 = arith.constant 0 : index
    %c0_38 = arith.constant 0 : index
    %63 = vector.load %arg3[%c0_35, %c2_36, %c0_37, %c0_38] : memref<1x3x2x128xf32, #tpu.memory_space<vmem>>, vector<1x1x2x128xf32>
    %64 = vector.shape_cast %63 : vector<1x1x2x128xf32> to vector<2x128xf32>
    %65 = vector.shape_cast %62 : vector<2x128xf32> to vector<1x1x2x128xf32>
    tpu.vector_store %arg3[%c0_35, %c2_36, %c0_37, %c0_38], %65 {strides = array<i32>} : memref<1x3x2x128xf32, #tpu.memory_space<vmem>>, vector<1x1x2x128xf32>,
    return
  }
  func.func @transform_0(%arg0: i32, %arg1: i32) -> (i32, i32, i32, i32) {
    %c0_i32 = arith.constant 0 : i32
    %c0_i32_0 = arith.constant 0 : i32
    %c0_i32_1 = arith.constant 0 : i32
    return %arg0, %c0_i32, %arg1, %c0_i32_0 : i32, i32, i32, i32
  }
  func.func @transform_1(%arg0: i32, %arg1: i32) -> (i32, i32, i32, i32) {
    %c0_i32 = arith.constant 0 : i32
    %c0_i32_0 = arith.constant 0 : i32
    %c0_i32_1 = arith.constant 0 : i32
    return %arg0, %c0_i32, %arg1, %c0_i32_0 : i32, i32, i32, i32
  }
}

</mosaic_0001>

<bundles_post_ra>
// kernel: tpu_custom_call.1
= control target key start
LH: loop header
LB: loop body
LE: loop exit
PB: predicated region body
PF: predicated region fallthrough
CT: control target
= control target key end

     0   :  { %6 = vsyncpa [#allocation3], 0  ;;  %s686_s0 = inlined_call_operand.hbm [shape: f32[2,3,2,128], index: 0, kind: input, shape index: {}]   ;;  %s687_s1 = inlined_call_operand.hbm [shape: f32[2,3,2,128], index: 1, kind: output, shape index: {}]  }
   0x1   :  { %8 = vsyncpa [#allocation3 + $0x1], 0 }
   0x2   :  { %9 = vsyncpa [#allocation4], 0 }
   0x3   :  { %11 = vsyncpa [#allocation4 + $0x1], 0  ;;  %s507_s6 = smov 0   ;;  %s509_s7 = smov 0  }
   0x4   :  { %s511_s8 = smov 0   ;;  %s513_s9 = smov 0  }
   0x5   :  { %s515_s10 = smov 0   ;;  %s517_s11 = smov 0  }
   0x6 LB: > { %s294_s12 = sadd.s32 4294967295, %s489_s11   ;;  %s295_s13 = sadd.s32 4294967294, %s489_s11   ;;  %s489_s11 = sphi %s517_s11, %s17_s11   ;;  %s485_s10 = sphi %s515_s10, %s702_s10   ;;  %s481_s9 = sphi %s513_s9, %s701_s9   ;;  %s477_s8 = sphi %s511_s8, %s700_s8   ;;  %s473_s7 = sphi %s509_s7, %s699_s7   ;;  %s469_s6 = sphi %s507_s6, %s698_s6  }
   0x7   : > { %s29_s14 = sadd.s32 1, %s485_s10  ;;  %s38_s15 = sadd.s32 1, %s477_s8 }
   0x8   : > { %p31_p0 = scmp.ge.s32.totalorder %s29_s14, 2  ;;  %p45_p1 = scmp.ne.s32.totalorder %s477_s8, %s473_s7 }
   0x9   : > { %p46_p2 = scmp.eq.s32.totalorder %s489_s11, 0  ;;  %p51_p3 = scmp.ne.s32.totalorder %s473_s7, %s469_s6 }
   0xa   : > { %s704_s14 = smov (%p31_p0, %s29_s14), 0  ;;  %p52_p5 = scmp.eq.s32.totalorder %s294_s12, 0 }
   0xb   : > { %p548_p4 = por %p46_p2, %p45_p1  ;;  %s33_s17 = ssub.s32 %s485_s10, %s704_s14 }
   0xc   : > { %p77_p6 = scmp.eq.s32.totalorder %s294_s12, 1  ;;  %p36_p7 = scmp.eq.s32.totalorder %s33_s17, 0 }
   0xd   : > { %p554_p8 = por %p52_p5, %p51_p3  ;;  %p83_p10 = scmp.eq.s32.totalorder %s295_s13, 1 }
   0xe   : > { %p558_p9 = por %p77_p6, %p45_p1  ;;  %p323_p13 = scmp.lt.s32.totalorder %s489_s11, 2 }
   0xf   : > { %s563_s20 = scalar_select %p36_p7, %s477_s8, %s38_s15  }
  0x10   : > { %s691_s19 = scalar_select %p558_p9, 1, 0 }
  0x11   : > { %p565_p11 = por %p83_p10, %p51_p3  ;;  %s103_s22 = sand.u32 1, %s477_s8  }
  0x12   : > { %s307_s23 = smul.u32 6, %s103_s22  ;;  %p575_p0 = pnand %p323_p13, %p548_p4 }
  0x13   : > { %s692_s21 = scalar_select %p565_p11, 1, 0 }
  0x14   : > { %s308_s24 = smul.u32 96, %s485_s10  ;;  %s107_s29 = scalar_lea.vmem [#allocation2], %s307_s23 }
  0x15   : > { %s115_s30 = sshll.u32 %s107_s29, 4  ;;  %s587_s2 = scalar_lea.sflag [#allocation3], %s103_s22  ;;  %s584_s30 = int_to_ptr.vmem [resolvable:$true] %s115_s30 }
  0x16   : > { %s582_s28 = scalar_lea.hbm %s686_s0, %s308_s24  ;;  %p379_p3 = pneg %p575_p0 }
  0x17   : > { %s377_s3 = scalar_lea.hbm %s582_s28, 96  ;;  %s382_s12 = scalar_lea.hbm %s686_s0, 192 }
  0x18   : > { %p378_p2 = scmp.ne.s32.totalorder %s582_s28, %s377_s3  ;;  %p383_p6 = scmp.lt.u32.totalorder %s582_s28, %s686_s0 }
  0x19   : > { %p384_p7 = scmp.lt.u32.totalorder %s382_s12, %s377_s3  ;;  %p386_p13 = scmp.lt.u32.totalorder %s377_s3, %s582_s28 }
  0x1a   : > { %p380_p4 = pnand %p379_p3, %p378_p2 }
  0x1b   : > { %p385_p10 = por %p384_p7, %p383_p6 }
  0x1c   : > { %p381_p5 = pneg %p380_p4 }
  0x1d   : > { %p387_p12 = por %p386_p13, %p385_p10 }
  0x1f   : > { %p388_p1 = pnand %p387_p12, %p381_p5 }
  0x21   : > { %391 = shalt.err (!%p388_p1)
}
  0x22   : > { %s392_s16 = scalar_lea.vmem %s584_s30, 96  ;;  %s491_s17 = smov [#allocation2]  }
  0x23   : > { %p393_p2 = scmp.ne.s32.totalorder %s584_s30, %s392_s16  ;;  %s397_s22 = sshll.u32 %s491_s17, 4  ;;  %s398_s22 = int_to_ptr.vmem [resolvable:$false] %s397_s22 }
  0x24   : > { %s399_s23 = scalar_lea.vmem %s398_s22, 192  ;;  %p400_p9 = scmp.lt.s32.totalorder %s584_s30, %s398_s22 }
  0x25   : > { %p395_p4 = pnand %p393_p2, %p379_p3  ;;  %p401_p6 = scmp.lt.s32.totalorder %s399_s23, %s392_s16 }
  0x27   : > { %p396_p11 = pneg %p395_p4  ;;  %p402_p7 = por %p401_p6, %p400_p9 }
  0x29   : > { %p403_p10 = pnand %p402_p7, %p396_p11 }
  0x2b   : > { %406 = shalt.err (!%p403_p10)
}
  0x2c   : > { %s492_s24 = smov 32   ;;  %s493_s26 = smov 2  }
  0x2d   : > { %318 = dma.hbm_to_vmem [thread:$0]  (!%p575_p0), %s582_s28, 96, %s584_s30, %s587_s2, %s492_s24, %s492_s24, %s493_s26  }
  0x2e   : > { %p123_p12 = scmp.lt.s32.totalorder %s489_s11, 3  ;;  %p694_p1 = scmp.ge.s32.totalorder %s489_s11, 1 }
  0x30   : > { %p124_p3 = pnand %p694_p1, %p123_p12 }
  0x31   : > { %s619_s27 = sand.u32 (!%p124_p3), 1, %s473_s7  }
  0x32   : > { %127 = sbr.rel (%p124_p3) target bundleno = 93 (0x5d), region = 24  ;;  %s130_s3 = scalar_lea.sflag (!%p124_p3), [#allocation3], %s619_s27 }
  0x33   : > { %s309_s29 = smul.u32 (!%p124_p3), 6, %s619_s27 }
  0x35   : > { %s133_s4 = scalar_lea.vmem (!%p124_p3), [#allocation2], %s309_s29 }
  0x39   : > { %460 = dma.done.wait (%p554_p8), %s130_s3, 96  }
  0x3a   : > { %462 = vsyncadd (%p554_p8), %s130_s3, 4294967200  ;;  %v152_v0 = vld [vmem:[%s133_s4] sm:$0x3]  ;;  %v300_v11 = vld [vmem:[%s133_s4 + $0x2] sm:$0x3]  ;;  %s151_s18 = scalar_lea.vmem [#allocation5], %s309_s29 }
  0x3b   : > { %v153_v1 = vmul.f32 0.95492965, %v152_v0  ;;  %v301_v12 = vld [vmem:[%s133_s4 + $0x4] sm:$0x3]  ;;  %s209_s25 = sshll.u32 %s151_s18, 4  ;;  %s310_s28 = smul.u32 96, %s481_s9  ;;  %s632_s25 = int_to_ptr.vmem [resolvable:$true] %s209_s25 }
  0x3c   : > { %v158_v18 = vmul.f32 %v301_v12, %v300_v11  ;;  %s195_s12 = scalar_lea.sflag [#allocation4], %s619_s27  ;;  %s407_s9 = scalar_lea.vmem %s632_s25, 96 }
  0x3d   : > { %vm159_vm0 = vcmp.ge.f32.partialorder %v153_v1, 1.0  ;;  %v160_v2 = vadd.f32 -1.0, %v153_v1  ;;  %v161_v3 = vadd.f32 5.0, %v153_v1  ;;  %vm170_vm1 = vcmp.ge.f32.partialorder %v153_v1, 3.0  ;;  %s637_s5 = scalar_lea.hbm %s687_s1, %s310_s28  ;;  %p408_p8 = scmp.ne.s32.totalorder %s632_s25, %s407_s9 }
  0x3e   : > { %v171_v4 = vadd.f32 -3.0, %v153_v1  ;;  %v172_v5 = vadd.f32 3.0, %v153_v1  ;;  %vm182_vm2 = vcmp.ge.f32.partialorder %v153_v1, 5.0  ;;  %v183_v6 = vadd.f32 -5.0, %v153_v1  ;;  %p695_p9 = scmp.ne.s32.totalorder %s691_s19, 0  ;;  %s494_s13 = smov [#allocation5]  }
  0x3f   : > { %v162_v7 = vsel %vm159_vm0, %v160_v2, %v161_v3  ;;  %v184_v8 = vadd.f32 1.0, %v153_v1  ;;  %s411_s15 = sshll.u32 %s494_s13, 4  ;;  %s412_s15 = int_to_ptr.vmem [resolvable:$false] %s411_s15 }
  0x40   : > { %v163_v9 = vsub.f32 4.0, %v162_v7  ;;  %v173_v10 = vsel %vm170_vm1, %v171_v4, %v172_v5  ;;  %p409_p11 = pnand %p408_p8, %p695_p9  ;;  %s413_s16 = scalar_lea.vmem %s412_s15, 192 }
  0x41   : > { %v174_v13 = vsub.f32 4.0, %v173_v10  ;;  %v185_v14 = vsel %vm182_vm2, %v183_v6, %v184_v8  ;;  %p414_p5 = scmp.lt.s32.totalorder %s632_s25, %s412_s15  ;;  %p415_p13 = scmp.lt.s32.totalorder %s413_s16, %s407_s9 }
  0x42   : > { %v164_v15 = vmin.f32 %v162_v7, %v163_v9  ;;  %v186_v16 = vsub.f32 4.0, %v185_v14  ;;  %p410_p0 = pneg %p409_p11 }
  0x43   : > { %v175_v17 = vmin.f32 %v173_v10, %v174_v13  ;;  %p416_p2 = por %p415_p13, %p414_p5 }
  0x44   : > { %v165_v19 = vmax.f32 %v164_v15, 0.0  ;;  %v187_v20 = vmin.f32 %v185_v14, %v186_v16 }
  0x45   : > { %v176_v21 = vmax.f32 %v175_v17, 0.0  ;;  %p417_p4 = pnand %p416_p2, %p410_p0 }
  0x46   : > { %v166_v22 = vmin.f32 %v165_v19, 1.0  ;;  %v188_v23 = vmax.f32 %v187_v20, 0.0 }
  0x47   : > { %v177_v24 = vmin.f32 %v176_v21, 1.0 }
  0x48   : > { %v167_v25 = vmul.f32 %v166_v22, %v158_v18  ;;  %v189_v26 = vmin.f32 %v188_v23, 1.0 }
  0x49   : > { %v178_v27 = vmul.f32 %v177_v24, %v158_v18 }
  0x4a   : > { %v168_v28 = vsub.f32 %v301_v12, %v167_v25  ;;  %v190_v29 = vmul.f32 %v189_v26, %v158_v18 }
  0x4b   : > { %v179_v30 = vsub.f32 %v301_v12, %v178_v27 }
  0x4c   : > { %169 = vst [vmem:[%s151_s18] sm:$0x3] %v168_v28  ;;  %v191_v31 = vsub.f32 %v301_v12, %v190_v29 }
  0x4d   : > { %302 = vst [vmem:[%s151_s18 + $0x2] sm:$0x3] %v179_v30 }
  0x4e   : > { %303 = vst [vmem:[%s151_s18 + $0x4] sm:$0x3] %v191_v31 }
  0x4f   : > { %420 = shalt.err (!%p417_p4)
}
  0x50   : > { %s421_s17 = scalar_lea.hbm %s637_s5, 96  ;;  %s425_s24 = scalar_lea.hbm %s687_s1, 192 }
  0x51   : > { %p422_p6 = scmp.ne.s32.totalorder %s637_s5, %s421_s17  ;;  %p426_p12 = scmp.lt.u32.totalorder %s637_s5, %s687_s1 }
  0x52   : > { %p427_p1 = scmp.lt.u32.totalorder %s425_s24, %s421_s17  ;;  %p429_p8 = scmp.lt.u32.totalorder %s421_s17, %s637_s5 }
  0x53   : > { %p423_p7 = pnand %p422_p6, %p695_p9 }
  0x54   : > { %p428_p3 = por %p427_p1, %p426_p12 }
  0x55   : > { %p424_p10 = pneg %p423_p7 }
  0x56   : > { %p430_p11 = por %p429_p8, %p428_p3 }
  0x58   : > { %p431_p0 = pnand %p430_p11, %p424_p10 }
  0x5a   : > { %434 = shalt.err (!%p431_p0)
}
  0x5b   : > { %s495_s3 = smov 32   ;;  %s496_s4 = smov 2  }
  0x5c   : > { %313 = dma.vmem_to_hbm [thread:$0]  (%p695_p9), %s632_s25, 96, %s637_s5, %s195_s12, %s495_s3, %s495_s3, %s496_s4  }
  0x5d PF: > { %s224_s18 = sand.u32 1, %s469_s6   ;;  %p696_p5 = scmp.ne.s32.totalorder %s692_s21, 0 }
  0x5e   : > { %p697_p13 = scmp.ge.s32.totalorder %s489_s11, 2  ;;  %s225_s28 = scalar_lea.sflag [#allocation4], %s224_s18 }
  0x60   : > { %p320_p2 = pnand %p697_p13, %p696_p5 }
  0x62   : > { %464 = dma.done.wait (!%p320_p2), %s225_s28, 96  }
  0x63   : > { %466 = vsyncadd (!%p320_p2), %s225_s28, 4294967200  ;;  %s17_s11 = sadd.s32 1, %s489_s11   ;;  %s698_s6 = smov %s473_s7 }
  0x64   : > { %p14_p4 = scmp.ge.s32.totalorder %s17_s11, 4   ;;  %s699_s7 = smov %s477_s8 }
  0x65   : > { %s700_s8 = smov %s563_s20  ;;  %s701_s9 = smov %s485_s10 }
  0x66   : > { %s702_s10 = smov %s704_s14  ;;  %16 = sbr.rel (!%p14_p4) target bundleno = 6 (0x6), region = 73 }
  0x6d   :  { %230 = vsyncpa [#allocation3], 1 }
  0x6e   :  { %232 = vsyncpa [#allocation3 + $0x1], 1 }
  0x6f   :  { %233 = vsyncpa [#allocation4], 1 }
  0x70   :  { %235 = vsyncpa [#allocation4 + $0x1], 1 }

</bundles_post_ra>
